<compile_context>
chip_gen: v7x
topology: tpu7x:2x2x1
jax: 0.10.0
libtpu: 0.0.40
codegen_flags: <defaults>
</compile_context>

<pallas_src>
import functools

import numpy as np
import jax
import jax.numpy as jnp
from jax.experimental import pallas as pl
from jax.experimental.pallas import tpu as pltpu

LANE = 128

# ---- packed parameter layout: (136 rows, 64 lanes) f32, weights transposed --
P_ROWS, P_COLS = 136, 64
_B_LANE = 56          # bias column (single lane) shared by every layer
_W1_R = 0             # W1^T (25, 4):  rows 0:25,  lanes 0:4;   b1 at lane 56
_W2_R = 32            # W2^T (50, 25): rows 32:82, lanes 0:25;  b2 at lane 56
_WH_R = 88            # fused head (33, 50): rows 88:90 actor_lin1^T,
_HEAD_M = 33          #   rows 96:121 l3^T (sublane-aligned); bias at lane 56
_WC_R = 128           # critic_lin1^T (1, 25): row 128, lanes 0:25; bc lane 56

OUT_ROWS = 3          # output rows: 0:2 actor logits, 2 critic value


def _round_up(n, m):
    return ((n + m - 1) // m) * m


def actor_critic_kernel(p_ref, x_ref, out_ref, *, use_bf16=False):
    f32 = jnp.float32
    cdt = jnp.bfloat16 if use_bf16 else f32

    x = x_ref[...]                                       # (4, TB), batch on lanes

    # y = relu(l1(normalize(x)))  -- inv_norm already folded into W1^T.
    w1t = p_ref[_W1_R:_W1_R + 25, 0:4]
    b1 = p_ref[_W1_R:_W1_R + 25, _B_LANE:_B_LANE + 1]
    y = jnp.dot(w1t.astype(cdt), x.astype(cdt), preferred_element_type=f32)
    y = jnp.maximum(y + b1, 0.0)                         # (25, TB)

    # y = relu(l2(y))
    w2t = p_ref[_W2_R:_W2_R + 50, 0:25]
    b2 = p_ref[_W2_R:_W2_R + 50, _B_LANE:_B_LANE + 1]
    y = jnp.dot(w2t.astype(cdt), y.astype(cdt), preferred_element_type=f32)
    y = jnp.maximum(y + b2, 0.0)                         # (50, TB)

    # Fused head: rows 0:2 = raw actor logits (log_softmax over the batch dim
    # is hoisted to the wrapper), rows 8:33 = pre-ReLU l3 output.
    wht = p_ref[_WH_R:_WH_R + _HEAD_M, 0:50]
    bh = p_ref[_WH_R:_WH_R + _HEAD_M, _B_LANE:_B_LANE + 1]
    h = jnp.dot(wht.astype(cdt), y.astype(cdt), preferred_element_type=f32) + bh

    logits = h[0:2, :]                                   # (2, TB)
    c = jnp.maximum(h[8:8 + 25, :], 0.0)                 # (25, TB); detach = fwd no-op

    # critic = tanh(critic_lin1(c))
    wct = p_ref[_WC_R:_WC_R + 1, 0:25]                   # (1, 25)
    bc = p_ref[_WC_R:_WC_R + 1, _B_LANE:_B_LANE + 1]     # (1, 1)
    v = jnp.tanh(
        jnp.dot(wct.astype(cdt), c.astype(cdt), preferred_element_type=f32) + bc)

    # Direct sliced stores (no lane concatenation / zero broadcast).
    out_ref[0:2, :] = logits
    out_ref[2:3, :] = v


def pack_params(params):
    """Pack all weights/biases (transposed) into one (136, 64) f32 buffer."""
    (w1, b1, w2, b2, wa, ba, w3, b3, wc, bc) = params
    p = jnp.zeros((P_ROWS, P_COLS), jnp.float32)
    p = p.at[_W1_R:_W1_R + 25, 0:4].set(w1.T)
    p = p.at[_W1_R:_W1_R + 25, _B_LANE:_B_LANE + 1].set(b1.T)
    p = p.at[_W2_R:_W2_R + 50, 0:25].set(w2.T)
    p = p.at[_W2_R:_W2_R + 50, _B_LANE:_B_LANE + 1].set(b2.T)
    # Fused head: actor rows 0:2, l3 rows 8:33 (sublane-aligned offset).
    p = p.at[_WH_R:_WH_R + 2, 0:50].set(wa.T)
    p = p.at[_WH_R:_WH_R + 2, _B_LANE:_B_LANE + 1].set(ba.T)
    p = p.at[_WH_R + 8:_WH_R + 33, 0:50].set(w3.T)
    p = p.at[_WH_R + 8:_WH_R + 33, _B_LANE:_B_LANE + 1].set(b3.T)
    p = p.at[_WC_R:_WC_R + 1, 0:25].set(wc.T)
    p = p.at[_WC_R:_WC_R + 1, _B_LANE:_B_LANE + 1].set(bc)
    return p


def actor_critic_forward(x, packed_params, *, tile_b=8192, use_bf16=False):
    """x: (B, 4) f32, packed_params: (136, 64) f32 from pack_params.

    Returns (actor (B, 2), critic (B, 1))."""
    B = x.shape[0]
    x = x.astype(jnp.float32)

    # Hoisted batch reduction #1 (F.normalize dim=0): fold the per-column
    # inverse L2 norms into W1^T (one ~34 KiB XLA-side update per call).
    inv_norm = 1.0 / jnp.maximum(jnp.sqrt(jnp.sum(x * x, axis=0)), 1e-12)   # (4,)
    p = packed_params.at[_W1_R:_W1_R + 25, 0:4].multiply(inv_norm[None, :])

    xt = x.T                                             # (4, B): batch on lanes

    # Lane-multiple tile; keep >= 2 grid steps when possible so
    # dimension_semantics=("parallel",) uses both TensorCores on v7x.
    tb = min(int(tile_b), _round_up(pl.cdiv(B, 2), LANE))
    tb = max(LANE, _round_up(tb, LANE))
    b_pad = _round_up(B, tb)
    if b_pad != B:
        xt = jnp.pad(xt, ((0, 0), (0, b_pad - B)))

    kernel = functools.partial(actor_critic_kernel, use_bf16=use_bf16)
    out = pl.pallas_call(
        kernel,
        out_shape=jax.ShapeDtypeStruct((OUT_ROWS, b_pad), jnp.float32),
        grid_spec=pltpu.PrefetchScalarGridSpec(
            num_scalar_prefetch=0,
            grid=(b_pad // tb,),
            in_specs=[
                pl.BlockSpec((P_ROWS, P_COLS), lambda i: (0, 0)),  # params, resident
                pl.BlockSpec((4, tb), lambda i: (0, i)),           # x tile
            ],
            out_specs=pl.BlockSpec((OUT_ROWS, tb), lambda i: (0, i)),
        ),
        compiler_params=pltpu.CompilerParams(
            dimension_semantics=("parallel",),
        ),
    )(p, xt)

    logits = out[0:2, :B].T                              # (B, 2)
    critic = out[2:3, :B].T                              # (B, 1)
    # Hoisted batch reduction #2: log_softmax over the batch dim on (B, 2).
    actor = jax.nn.log_softmax(logits, axis=0)
    return actor, critic


def init_params(key):
    """nn.Linear-style init; weights stored as (in_features, out_features)."""
    def linear(key, fan_in, fan_out):
        kw, kb = jax.random.split(key)
        bound = 1.0 / np.sqrt(fan_in)
        w = jax.random.uniform(kw, (fan_in, fan_out), jnp.float32, -bound, bound)
        b = jax.random.uniform(kb, (1, fan_out), jnp.float32, -bound, bound)
        return w, b

    k1, k2, k3, k4, k5 = jax.random.split(key, 5)
    w1, b1 = linear(k1, 4, 25)    # l1
    w2, b2 = linear(k2, 25, 50)   # l2
    wa, ba = linear(k3, 50, 2)    # actor_lin1
    w3, b3 = linear(k4, 50, 25)   # l3
    wc, bc = linear(k5, 25, 1)    # critic_lin1
    return (w1, b1, w2, b2, wa, ba, w3, b3, wc, bc)


def reference_forward(x, params):
    (w1, b1, w2, b2, wa, ba, w3, b3, wc, bc) = params
    xn = x / jnp.maximum(jnp.sqrt(jnp.sum(x * x, axis=0, keepdims=True)), 1e-12)
    y = jax.nn.relu(xn @ w1 + b1)
    y = jax.nn.relu(y @ w2 + b2)
    actor = jax.nn.log_softmax(y @ wa + ba, axis=0)
    c = jax.nn.relu(y @ w3 + b3)
    critic = jnp.tanh(c @ wc + bc)
    return actor, critic


if __name__ == "__main__":
    key = jax.random.PRNGKey(0)
    kp, kx, kx2 = jax.random.split(key, 3)
    params = init_params(kp)
    packed = pack_params(params)

    fwd = jax.jit(actor_critic_forward, static_argnames=("tile_b", "use_bf16"))

    # Small single-tile case (batch=8, features=4 per the module spec).
    B = 8
    x = jax.random.normal(kx, (B, 4), jnp.float32)
    actor, critic = fwd(x, packed)
    jax.block_until_ready((actor, critic))
    actor_ref, critic_ref = reference_forward(x, params)
    assert actor.shape == (B, 2) and critic.shape == (B, 1)
    np.testing.assert_allclose(np.asarray(actor), np.asarray(actor_ref),
                               rtol=1e-5, atol=1e-5)
    np.testing.assert_allclose(np.asarray(critic), np.asarray(critic_ref),
                               rtol=1e-5, atol=1e-5)

    # Multi-tile case (batch 300 padded to 384 -> 3 lane blocks of 128).
    B2 = 300
    x2 = jax.random.normal(kx2, (B2, 4), jnp.float32)
    actor2, critic2 = fwd(x2, packed, tile_b=128)
    jax.block_until_ready((actor2, critic2))
    actor2_ref, critic2_ref = reference_forward(x2, params)
    np.testing.assert_allclose(np.asarray(actor2), np.asarray(actor2_ref),
                               rtol=1e-5, atol=1e-5)
    np.testing.assert_allclose(np.asarray(critic2), np.asarray(critic2_ref),
                               rtol=1e-5, atol=1e-5)

    print("KERNEL_OK")
</pallas_src>

<mosaic_0001>
module attributes {stable_mosaic.version = 11 : i64} {
  func.func @actor_critic_kernel(%arg0: i32, %arg1: memref<136x64xf32, #tpu.memory_space<vmem>>, %arg2: memref<4x128xf32, #tpu.memory_space<vmem>>, %arg3: memref<3x128xf32, #tpu.memory_space<vmem>>) attributes {dimension_semantics = [#tpu.dimension_semantics<parallel>], iteration_bounds = array<i64: 1>, scalar_prefetch = 0 : i64, scratch_operands = 0 : i64, tpu.core_type = #tpu.core_type<tc>, window_params = [{pipeline_mode = #tpu.pipeline_mode<synchronous>, transform_indices = @transform_0, window_bounds = array<i64: 136, 64>}, {transform_indices = @transform_1, window_bounds = array<i64: 4, 128>}, {transform_indices = @transform_2, window_bounds = array<i64: 3, 128>}]} {
    %c0 = arith.constant 0 : index
    %c0_0 = arith.constant 0 : index
    %0 = vector.load %arg2[%c0, %c0_0] : memref<4x128xf32, #tpu.memory_space<vmem>>, vector<4x128xf32>
    %c0_1 = arith.constant 0 : index
    %c0_2 = arith.constant 0 : index
    %1 = vector.load %arg1[%c0_1, %c0_2] : memref<136x64xf32, #tpu.memory_space<vmem>>, vector<25x4xf32>
    %c0_3 = arith.constant 0 : index
    %c56 = arith.constant 56 : index
    %2 = vector.load %arg1[%c0_3, %c56] : memref<136x64xf32, #tpu.memory_space<vmem>>, vector<25x1xf32>
    %cst = arith.constant dense<0.000000e+00> : vector<25x128xf32>
    %3 = tpu.matmul %1, %0, %cst {dimension_numbers = #tpu.dot_dimension_numbers<[1], [0], [0], [1], [0, 0, 1, 1], [], []>} : vector<25x4xf32>, vector<4x128xf32>, vector<25x128xf32> -> vector<25x128xf32>
    %4 = vector.broadcast %2 : vector<25x1xf32> to vector<25x128xf32>
    %5 = arith.addf %3, %4 : vector<25x128xf32>
    %cst_4 = arith.constant 0.000000e+00 : f32
    %6 = vector.broadcast %cst_4 : f32 to vector<25x128xf32>
    %7 = arith.maximumf %5, %6 : vector<25x128xf32>
    %c32 = arith.constant 32 : index
    %c0_5 = arith.constant 0 : index
    %8 = vector.load %arg1[%c32, %c0_5] : memref<136x64xf32, #tpu.memory_space<vmem>>, vector<50x25xf32>
    %c32_6 = arith.constant 32 : index
    %c56_7 = arith.constant 56 : index
    %9 = vector.load %arg1[%c32_6, %c56_7] : memref<136x64xf32, #tpu.memory_space<vmem>>, vector<50x1xf32>
    %cst_8 = arith.constant dense<0.000000e+00> : vector<50x128xf32>
    %10 = tpu.matmul %8, %7, %cst_8 {dimension_numbers = #tpu.dot_dimension_numbers<[1], [0], [0], [1], [0, 0, 1, 1], [], []>} : vector<50x25xf32>, vector<25x128xf32>, vector<50x128xf32> -> vector<50x128xf32>
    %11 = vector.broadcast %9 : vector<50x1xf32> to vector<50x128xf32>
    %12 = arith.addf %10, %11 : vector<50x128xf32>
    %cst_9 = arith.constant 0.000000e+00 : f32
    %13 = vector.broadcast %cst_9 : f32 to vector<50x128xf32>
    %14 = arith.maximumf %12, %13 : vector<50x128xf32>
    %c88 = arith.constant 88 : index
    %c0_10 = arith.constant 0 : index
    %15 = vector.load %arg1[%c88, %c0_10] : memref<136x64xf32, #tpu.memory_space<vmem>>, vector<33x50xf32>
    %c88_11 = arith.constant 88 : index
    %c56_12 = arith.constant 56 : index
    %16 = vector.load %arg1[%c88_11, %c56_12] : memref<136x64xf32, #tpu.memory_space<vmem>>, vector<33x1xf32>
    %cst_13 = arith.constant dense<0.000000e+00> : vector<33x128xf32>
    %17 = tpu.matmul %15, %14, %cst_13 {dimension_numbers = #tpu.dot_dimension_numbers<[1], [0], [0], [1], [0, 0, 1, 1], [], []>} : vector<33x50xf32>, vector<50x128xf32>, vector<33x128xf32> -> vector<33x128xf32>
    %18 = vector.broadcast %16 : vector<33x1xf32> to vector<33x128xf32>
    %19 = arith.addf %17, %18 : vector<33x128xf32>
    %20 = vector.extract_strided_slice %19 {offsets = [0, 0], sizes = [2, 128], strides = [1, 1]} : vector<33x128xf32> to vector<2x128xf32>
    %21 = vector.extract_strided_slice %19 {offsets = [8, 0], sizes = [25, 128], strides = [1, 1]} : vector<33x128xf32> to vector<25x128xf32>
    %cst_14 = arith.constant 0.000000e+00 : f32
    %22 = vector.broadcast %cst_14 : f32 to vector<25x128xf32>
    %23 = arith.maximumf %21, %22 : vector<25x128xf32>
    %c128 = arith.constant 128 : index
    %c0_15 = arith.constant 0 : index
    %24 = vector.load %arg1[%c128, %c0_15] : memref<136x64xf32, #tpu.memory_space<vmem>>, vector<1x25xf32>
    %c128_16 = arith.constant 128 : index
    %c56_17 = arith.constant 56 : index
    %25 = vector.load %arg1[%c128_16, %c56_17] : memref<136x64xf32, #tpu.memory_space<vmem>>, vector<1x1xf32>
    %cst_18 = arith.constant dense<0.000000e+00> : vector<1x128xf32>
    %26 = tpu.matmul %24, %23, %cst_18 {dimension_numbers = #tpu.dot_dimension_numbers<[1], [0], [0], [1], [0, 0, 1, 1], [], []>} : vector<1x25xf32>, vector<25x128xf32>, vector<1x128xf32> -> vector<1x128xf32>
    %27 = vector.broadcast %25 : vector<1x1xf32> to vector<1x128xf32>
    %28 = arith.addf %26, %27 : vector<1x128xf32>
    %29 = math.tanh %28 : vector<1x128xf32>
    %c0_19 = arith.constant 0 : index
    %c0_20 = arith.constant 0 : index
    %30 = vector.load %arg3[%c0_19, %c0_20] : memref<3x128xf32, #tpu.memory_space<vmem>>, vector<2x128xf32>
    tpu.vector_store %arg3[%c0_19, %c0_20], %20 {strides = array<i32>} : memref<3x128xf32, #tpu.memory_space<vmem>>, vector<2x128xf32>,
    %c2 = arith.constant 2 : index
    %c0_21 = arith.constant 0 : index
    %31 = vector.load %arg3[%c2, %c0_21] : memref<3x128xf32, #tpu.memory_space<vmem>>, vector<1x128xf32>
    tpu.vector_store %arg3[%c2, %c0_21], %29 {strides = array<i32>} : memref<3x128xf32, #tpu.memory_space<vmem>>, vector<1x128xf32>,
    return
  }
  func.func @transform_0(%arg0: i32) -> (i32, i32) {
    %c0_i32 = arith.constant 0 : i32
    %c0_i32_0 = arith.constant 0 : i32
    %c0_i32_1 = arith.constant 0 : i32
    return %c0_i32, %c0_i32_0 : i32, i32
  }
  func.func @transform_1(%arg0: i32) -> (i32, i32) {
    %c0_i32 = arith.constant 0 : i32
    %c0_i32_0 = arith.constant 0 : i32
    return %c0_i32, %arg0 : i32, i32
  }
  func.func @transform_2(%arg0: i32) -> (i32, i32) {
    %c0_i32 = arith.constant 0 : i32
    %c0_i32_0 = arith.constant 0 : i32
    return %c0_i32, %arg0 : i32, i32
  }
}

</mosaic_0001>

<bundles_post_ra>
// kernel: actor_critic_forward.1
= control target key start
LH: loop header
LB: loop body
LE: loop exit
PB: predicated region body
PF: predicated region fallthrough
CT: control target
= control target key end

     0   :  { %vm45_vm0 = vcmask 1043456   ;;  %vm36_vm1 = vcmask 31744   ;;  %v696_v3 = vmov 56   ;;  %v697_v19 = vmov 0.0|0.0   ;;  %s854_s1 = inlined_call_operand.vmem [shape: f32[4,128], index: 1, kind: input, shape index: {}]   ;;  %s855_s0 = inlined_call_operand.vmem [shape: f32[136,64], index: 0, kind: input, shape index: {}]   ;;  %s856_s2 = inlined_call_operand.vmem [shape: f32[3,128], index: 2, kind: output, shape index: {}]  }
   0x1   :  { %v11_v0 = vld [vmem:[%s854_s1] sm:$0xf]  ;;  %v13_v2 = vld [vmem:[%s855_s0 + $0x8] sm:$0xff]  ;;  %692 = vset.pattern.permute.xlu0 %v696_v3  ;;  %693 = vset.pattern.permute.xlu1 %v696_v3  ;;  %v14_v4 = vld [vmem:[%s855_s0 + $0x10] sm:$0xff]  ;;  %vm698_vm2 = vmmov 0   ;;  %v699_v20 = vmov 0.0  }
   0x2   :  { %v12_v1 = vld [vmem:[%s855_s0] sm:$0xff]  ;;  %587 = vmatprep.subr.msk.mxu1 %vm45_vm0, %v11_v0  ;;  %28 = vperm.xlu1 %693, %v14_v4   ;;  %v15_v5 = vld [vmem:[%s855_s0 + $0x18] sm:$0x1]  ;;  %v139_v7 = vld [vmem:[%s855_s0 + $0x28] sm:$0xff]  ;;  %vm195_vm3 = vcmask 1040384   ;;  %vm700_vm4 = vmmov 1  }
   0x3   :  { %589 = vmatprep.mubr.msk.f32.mxu1 %vm36_vm1, %v12_v1  ;;  %588 = vmatpush3.msk.msra.mxu1 %vm45_vm0, %v11_v0  ;;  %v138_v6 = vld [vmem:[%s855_s0 + $0x20] sm:$0xff]  ;;  %v140_v8 = vld [vmem:[%s855_s0 + $0x30] sm:$0xff]  ;;  %v141_v9 = vld [vmem:[%s855_s0 + $0x38] sm:$0xff]  ;;  %vm180_vm6 = vcmask 203776   ;;  %vm347_vm7 = vcmask 1041408   ;;  %vm336_vm8 = vcmask 408576  }
   0x4   :  { %18 = vperm.xlu0 %692, %v12_v1   ;;  %590 = vmatmul.mubr.msk.f32.vlgmr.msra.gmra.mrb[0].mxu1 %vm36_vm1, %v13_v2  ;;  %v142_v10 = vld [vmem:[%s855_s0 + $0x40] sm:$0xff]  ;;  %v143_v11 = vld [vmem:[%s855_s0 + $0x48] sm:$0xff]  ;;  %v144_v12 = vld [vmem:[%s855_s0 + $0x50] sm:$0x3] }
   0x5   :  { %592 = vmatprep.mubr.msk.f32.mxu1 %vm36_vm1, %v14_v4  ;;  %v759_v13 = vld [vmem:[%s855_s0 + $0x60] sm:$0xff]  ;;  %v764_v14 = vld [vmem:[%s855_s0 + $0x68] sm:$0xff]  ;;  %v770_v15 = vld [vmem:[%s855_s0 + $0x70] sm:$0xff]  ;;  %664 = vmatprep.subr.bf16.mxu1 %v697_v19 }
   0x6   :  { %33 = vperm.xlu1 %693, %v15_v5   ;;  %v776_v16 = vld [vmem:[%s855_s0 + $0x78] sm:$0x1]  ;;  %v782_v17 = vld [vmem:[%s855_s0 + $0x80] sm:$0x1]  ;;  %671 = vmatprep.subr.bf16.mxu0 %v697_v19  ;;  %vm799_vm5 = vmpackc.low %vm195_vm3, %vm700_vm4 }
   0x7   :  { %v788_v18 = vld [vmem:[%s855_s0 + $0x58] sm:$0xff]  ;;  %638 = vmatprep.mubr.msk.f32.mxu0 %vm698_vm2, %v699_v20 }
   0x8   :  { %23 = vperm.xlu0 %692, %v13_v2   ;;  %593 = vmatmul.mubr.msk.f32.gmra.mrb[2].mxu1 %vm36_vm1, %v15_v5 }
   0x9   :  { %603 = vmatprep.mubr.msk.f32.mxu1 %vm698_vm2, %v699_v20 }
   0xa   :  { %152 = vperm.xlu1 %693, %v139_v7  }
   0xc   :  { %147 = vperm.xlu0 %692, %v138_v6  }
   0xe   :  { %162 = vperm.xlu1 %693, %v141_v9  }
  0x10   :  { %157 = vperm.xlu0 %692, %v140_v8  }
  0x12   :  { %172 = vperm.xlu1 %693, %v143_v11  }
  0x14   :  { %167 = vperm.xlu0 %692, %v142_v10  }
  0x16   :  { %318 = vperm.xlu1 %693, %v759_v13  }
  0x18   :  { %177 = vperm.xlu0 %692, %v144_v12  }
  0x1a   :  { %328 = vperm.xlu1 %693, %v770_v15  }
  0x1c   :  { %323 = vperm.xlu0 %692, %v764_v14  }
  0x1e   :  { %448 = vperm.xlu1 %693, %v782_v17  }
  0x20   :  { %333 = vperm.xlu0 %692, %v776_v16  }
  0x24   :  { %313 = vperm.xlu0 %692, %v788_v18  }
  0x81   :  { %v29_v22 = vpop.permute.xlu1 %28 }
  0x83   :  { %v19_v21 = vpop.permute.xlu0 %18 }
  0x85   :  { %v34_v29 = vpop.permute.xlu1 %33 }
  0x87   :  { %v24_v23 = vpop.permute.xlu0 %23 }
  0x89   :  { %v153_v44 = vpop.permute.xlu1 %152 }
  0x8b   :  { %v148_v42 = vpop.permute.xlu0 %147 }
  0x8d   :  { %v163_v55 = vpop.permute.xlu1 %162 }
  0x8f   :  { %v158_v53 = vpop.permute.xlu0 %157 }
  0x91   :  { %v173_v2 = vpop.permute.xlu1 %172 }
  0x93   :  { %v168_v0 = vpop.permute.xlu0 %167 }
  0xd7   :  { %v591_v24 = vpop.f32.mrb[0].mxu1 }
  0xd8   :  { %v121_v25 = vadd.f32 %v591_v24, %v24_v23  ;;  %v115_v26 = vpop.f32.mrb[1].mxu1 }
  0xd9   :  { %v116_v27 = vadd.f32 %v115_v26, %v19_v21  ;;  %v319_v26 = vpop.permute.xlu1 %318 }
  0xda   :  { %v135_v28 = vmax.f32 %v121_v25, 0.0 }
  0xdb   :  { %v134_v30 = vmax.f32 %v116_v27, 0.0  ;;  %v594_v31 = vpop.f32.mrb[2].mxu1 }
  0xdc   :  { %v131_v32 = vadd.f32 %v594_v31, %v34_v29  ;;  %v125_v33 = vpop.f32.mrb[3].mxu1 }
  0xdd   :  { %v665_v34 = vpack.c.bf16 %v135_v28, %v134_v30  ;;  %v126_v35 = vadd.f32 %v125_v33, %v29_v22 }
  0xde   :  { %v137_v36 = vmax.f32 %v131_v32, 0.0 }
  0xdf   :  { %v136_v37 = vmax.f32 %v126_v35, 0.0  ;;  %666 = vmatpush3.bf16.msra.mxu1 %v665_v34  ;;  %v329_v34 = vpop.permute.xlu1 %328 }
  0xe0   :  { %667 = vmatprep.subr.bf16.mxu1 %v697_v19 }
  0xe1   :  { %v668_v39 = vpack.c.bf16 %v137_v36, %v136_v37 }
  0xe3   :  { %670 = vmatpush3.bf16.msk.msra.mxu1 %vm799_vm5, %v668_v39 }
  0xe6   :  { %604 = vmatmul.mubr.msk.f32.vlgmr.msra.gmra.mrb[4].mxu1 %vm180_vm6, %v138_v6 }
  0xe7   :  { %606 = vmatprep.mubr.msk.f32.mxu1 %vm698_vm2, %v699_v20 }
  0xea   :  { %607 = vmatmul.mubr.msk.f32.gmra.mrb[6].mxu1 %vm180_vm6, %v139_v7 }
  0xeb   :  { %609 = vmatprep.mubr.msk.f32.mxu1 %vm698_vm2, %v699_v20 }
  0xee   :  { %610 = vmatmul.mubr.msk.f32.gmra.mrb[8].mxu1 %vm180_vm6, %v140_v8  ;;  %v178_v8 = vpop.permute.xlu0 %177 }
  0xef   :  { %612 = vmatprep.mubr.msk.f32.mxu1 %vm698_vm2, %v699_v20 }
  0xf2   :  { %613 = vmatmul.mubr.msk.f32.gmra.mrb[10].mxu1 %vm180_vm6, %v141_v9 }
  0xf3   :  { %615 = vmatprep.mubr.msk.f32.mxu1 %vm698_vm2, %v699_v20 }
  0xf6   :  { %616 = vmatmul.mubr.msk.f32.gmra.mrb[12].mxu1 %vm180_vm6, %v142_v10 }
  0xf7   :  { %618 = vmatprep.mubr.msk.f32.mxu1 %vm698_vm2, %v699_v20 }
  0xfa   :  { %619 = vmatmul.mubr.msk.f32.gmra.mrb[14].mxu1 %vm180_vm6, %v143_v11 }
  0xfb   :  { %621 = vmatprep.mubr.msk.f32.mxu1 %vm698_vm2, %v699_v20 }
  0xfe   :  { %622 = vmatmul.mubr.msk.f32.gmra.mrb[16].mxu1 %vm180_vm6, %v144_v12 }
 0x1b9   :  { %v265_v40 = vpop.f32.mrb[4].mxu1 }
 0x1ba   :  { %v605_v41 = vpop.f32.mrb[5].mxu1  ;;  %v266_v43 = vadd.f32 %v265_v40, %v148_v42 }
 0x1bc   :  { %v299_v48 = vmax.f32 %v266_v43, 0.0  ;;  %v449_v43 = vpop.permute.xlu1 %448 }
 0x1bd   :  { %v270_v45 = vpop.f32.mrb[6].mxu1 }
 0x1be   :  { %v271_v46 = vadd.f32 %v270_v45, %v153_v44  ;;  %v608_v47 = vpop.f32.mrb[7].mxu1 }
 0x1c0   :  { %v300_v49 = vmax.f32 %v271_v46, 0.0 }
 0x1c1   :  { %v275_v50 = vpop.f32.mrb[8].mxu1 }
 0x1c2   :  { %v611_v51 = vpop.f32.mrb[9].mxu1  ;;  %v672_v52 = vpack.c.bf16 %v300_v49, %v299_v48  ;;  %v276_v54 = vadd.f32 %v275_v50, %v158_v53 }
 0x1c4   :  { %673 = vmatpush3.bf16.msra.mxu0 %v672_v52  ;;  %v301_v59 = vmax.f32 %v276_v54, 0.0 }
 0x1c5   :  { %v280_v56 = vpop.f32.mrb[10].mxu1  ;;  %674 = vmatprep.subr.bf16.mxu0 %v697_v19 }
 0x1c6   :  { %v281_v57 = vadd.f32 %v280_v56, %v163_v55  ;;  %v614_v58 = vpop.f32.mrb[11].mxu1 }
 0x1c8   :  { %v302_v60 = vmax.f32 %v281_v57, 0.0 }
 0x1c9   :  { %v285_v61 = vpop.f32.mrb[12].mxu1 }
 0x1ca   :  { %v675_v62 = vpack.c.bf16 %v302_v60, %v301_v59  ;;  %v617_v63 = vpop.f32.mrb[13].mxu1  ;;  %v286_v1 = vadd.f32 %v285_v61, %v168_v0 }
 0x1cc   :  { %676 = vmatpush3.bf16.msra.mxu0 %v675_v62  ;;  %v303_v6 = vmax.f32 %v286_v1, 0.0 }
 0x1cd   :  { %v290_v3 = vpop.f32.mrb[14].mxu1  ;;  %677 = vmatprep.subr.bf16.mxu0 %v697_v19 }
 0x1ce   :  { %v291_v4 = vadd.f32 %v290_v3, %v173_v2  ;;  %v620_v5 = vpop.f32.mrb[15].mxu1 }
 0x1d0   :  { %v304_v7 = vmax.f32 %v291_v4, 0.0 }
 0x1d1   :  { %v295_v9 = vpop.f32.mrb[16].mxu1 }
 0x1d2   :  { %v678_v10 = vpack.c.bf16 %v304_v7, %v303_v6  ;;  %v296_v11 = vadd.f32 %v295_v9, %v178_v8  ;;  %v623_v12 = vpop.f32.mrb[17].mxu1 }
 0x1d4   :  { %679 = vmatpush3.bf16.msra.mxu0 %v678_v10  ;;  %v305_v21 = vmax.f32 %v296_v11, 0.0 }
 0x1d5   :  { %636 = vmatprep.subr.mxu0 %v699_v20 }
 0x1d8   :  { %637 = vmatpush3.msk.msra.mxu0 %vm347_vm7, %v305_v21 }
 0x1d9   :  { %639 = vmatmul.mubr.msk.f32.vlgmr.msra.gmra.mrb[0].mxu0 %vm336_vm8, %v788_v18  ;;  %680 = vmatprep.subr.bf16.mxu0 %v697_v19  ;;  %v324_v18 = vpop.permute.xlu0 %323 }
 0x1da   :  { %641 = vmatprep.mubr.msk.f32.mxu0 %vm698_vm2, %v699_v20 }
 0x1dd   :  { %642 = vmatmul.mubr.msk.f32.gmra.mrb[2].mxu0 %vm336_vm8, %v759_v13  ;;  %v334_v13 = vpop.permute.xlu0 %333 }
 0x1de   :  { %644 = vmatprep.mubr.msk.f32.mxu0 %vm698_vm2, %v699_v20 }
 0x1e1   :  { %645 = vmatmul.mubr.msk.f32.gmra.mrb[4].mxu0 %vm336_vm8, %v764_v14  ;;  %v314_v22 = vpop.permute.xlu0 %313 }
 0x1e2   :  { %647 = vmatprep.mubr.msk.f32.mxu0 %vm698_vm2, %v699_v20 }
 0x1e5   :  { %648 = vmatmul.mubr.msk.f32.gmra.mrb[6].mxu0 %vm336_vm8, %v770_v15 }
 0x1e6   :  { %650 = vmatprep.mubr.msk.f32.mxu0 %vm698_vm2, %v699_v20 }
 0x1e9   :  { %651 = vmatmul.mubr.msk.f32.gmra.mrb[8].mxu0 %vm336_vm8, %v776_v16 }
 0x1ea   :  { %661 = vmatprep.mubr.msk.f32.mxu0 %vm698_vm2, %v699_v20 }
 0x2ac   :  { %v417_v23 = vpop.f32.mrb[0].mxu0 }
 0x2ad   :  { %v418_v24 = vadd.f32 %v417_v23, %v314_v22  ;;  %v640_v25 = vpop.f32.mrb[1].mxu0 }
 0x2af   :  { %527 = vst [vmem:[%s856_s2] sm:$0x3] %v418_v24 }
 0x2b0   :  { %v422_v14 = vpop.f32.mrb[2].mxu0 }
 0x2b1   :  { %v643_v15 = vpop.f32.mrb[3].mxu0  ;;  %v423_v27 = vadd.f32 %v422_v14, %v319_v26 }
 0x2b3   :  { %v441_v30 = vmax.f32 %v423_v27, 0.0 }
 0x2b4   :  { %v427_v28 = vpop.f32.mrb[4].mxu0 }
 0x2b5   :  { %v428_v29 = vadd.f32 %v427_v28, %v324_v18  ;;  %v646_v16 = vpop.f32.mrb[5].mxu0 }
 0x2b7   :  { %v442_v31 = vmax.f32 %v428_v29, 0.0 }
 0x2b8   :  { %v432_v20 = vpop.f32.mrb[6].mxu0 }
 0x2b9   :  { %v681_v32 = vpack.c.bf16 %v442_v31, %v441_v30  ;;  %v649_v33 = vpop.f32.mrb[7].mxu0  ;;  %v433_v35 = vadd.f32 %v432_v20, %v329_v34 }
 0x2bb   :  { %682 = vmatpush3.bf16.msra.mxu0 %v681_v32  ;;  %v443_v40 = vmax.f32 %v433_v35, 0.0 }
 0x2bc   :  { %v437_v36 = vpop.f32.mrb[8].mxu0  ;;  %683 = vmatprep.subr.bf16.mxu0 %v697_v19 }
 0x2bd   :  { %v438_v37 = vadd.f32 %v437_v36, %v334_v13  ;;  %v652_v39 = vpop.f32.mrb[9].mxu0 }
 0x2bf   :  { %v444_v41 = vmax.f32 %v438_v37, 0.0 }
 0x2c1   :  { %v684_v42 = vpack.c.bf16 %v444_v41, %v443_v40 }
 0x2c3   :  { %686 = vmatpush3.bf16.msk.msra.mxu0 %vm799_vm5, %v684_v42 }
 0x2c6   :  { %662 = vmatmul.mubr.msk.f32.vlgmr.msra.gmra.mrb[10].mxu0 %vm180_vm6, %v782_v17 }
 0x399   :  { %v522_v44 = vpop.f32.mrb[10].mxu0 }
 0x39a   :  { %v523_v45 = vadd.f32 %v522_v44, %v449_v43  ;;  %v663_v46 = vpop.f32.mrb[11].mxu0 }
 0x39c   :  { %694 = vtanh.f32 %v523_v45 }
 0x3a6   :  { %v695_v47 = vpop.eup %694 }
 0x3a7   :  { %528 = vst [vmem:[%s856_s2 + $0x2] sm:$0x1] %v695_v47 }

</bundles_post_ra>
